<compile_context>
chip_gen: v7x
topology: tpu7x:2x2x1
jax: 0.10.0
libtpu: 0.0.40
codegen_flags: <defaults>
</compile_context>

<pallas_src>
import functools

import jax
import jax.numpy as jnp
from jax.experimental import pallas as pl
from jax.experimental.pallas import tpu as pltpu


# --------------------------------------------------------------------------
# Kernels
# --------------------------------------------------------------------------
def _rmsnorm_kernel_plain(x_ref, w_ref, o_ref, *, eps):
    # x_ref: (row_tile, H) with H == num_features on the lane axis.
    x32 = x_ref[...].astype(jnp.float32)                      # x.float()
    mean_sq = jnp.mean(x32 * x32, axis=-1, keepdims=True)
    # x * rsqrt(mean + eps), then .type_as(x) (intentional double rounding to
    # match the PyTorch module), then * weight (jnp promotion == torch).
    normed = (x32 * jax.lax.rsqrt(mean_sq + eps)).astype(x_ref.dtype)
    o_ref[...] = (normed * w_ref[...]).astype(o_ref.dtype)


def _rmsnorm_kernel_folded(x_ref, w_ref, seg_ref, o_ref, *, eps, num_features):
    # x_ref: (row_tile, W) with W = fold * num_features (several logical rows
    #        packed into one 128-lane row).
    # w_ref: (1, W) weight tiled `fold` times.
    # seg_ref: (W, W) block-diagonal ones matrix, resident in VMEM (same block
    #          index every grid step), used on the MXU to compute and
    #          broadcast the per-segment mean in one matmul.
    x32 = x_ref[...].astype(jnp.float32)
    xsq = x32 * x32
    mean_sq = jnp.dot(xsq, seg_ref[...],
                      preferred_element_type=jnp.float32) * (1.0 / num_features)
    normed = (x32 * jax.lax.rsqrt(mean_sq + eps)).astype(x_ref.dtype)
    o_ref[...] = (normed * w_ref[...]).astype(o_ref.dtype)


# --------------------------------------------------------------------------
# Tiling helpers
# --------------------------------------------------------------------------
def _vmem_capacity_bytes() -> int:
    """Per-core VMEM capacity; conservative (v7x-sized) fallback."""
    try:
        info = pltpu.get_tpu_info()
        cap = getattr(info, "vmem_capacity_bytes", None)
        if cap:
            return int(cap)
    except Exception:
        pass
    return 64 * 1024 * 1024


def _pick_row_tile(rows, width, x_bytes, out_bytes, fixed_bytes,
                   vmem_budget_bytes):
    """Largest row tile whose double-buffered in/out tiles plus live f32 temps
    (x32, xsq, normed) fit the budget, while keeping >= 4 grid steps when
    there is enough work (megacore balance on v7x)."""
    per_row = width * (2 * x_bytes + 2 * out_bytes + 3 * 4)
    max_tile = max(8, (vmem_budget_bytes - fixed_bytes) // per_row)
    if rows <= max_tile and rows <= 1024:
        return rows                           # single block == full dim (legal)
    tile = min(max_tile, 8192, rows)
    if rows >= 1024:
        # Keep at least ~4 grid steps so both v7x TCs get work.
        tile = min(tile, max(256, -(-rows // 4)))
    tile = max(32, (tile // 32) * 32)         # sublane-pack friendly
    return min(tile, rows)


# --------------------------------------------------------------------------
# Wrapper
# --------------------------------------------------------------------------
def openelm_rmsnorm(x: jax.Array, weight: jax.Array, eps: float = 1e-6,
                    row_tile: int | None = None) -> jax.Array:
    """RMSNorm over the last axis of x, scaled by `weight` (shape [H])."""
    orig_shape = x.shape
    hidden = orig_shape[-1]
    assert weight.shape == (hidden,)

    out_dtype = jnp.promote_types(x.dtype, weight.dtype)

    rows = 1
    for d in orig_shape[:-1]:
        rows *= d

    # Lane-dense packing for small hidden sizes: fold several logical rows
    # into one 128-lane row. Rows are padded up to a multiple of `fold` so
    # this path always applies when 128 % H == 0 (dense 128-lane stores).
    fold = 1
    if hidden < 128 and 128 % hidden == 0:
        fold = 128 // hidden
    rows_pad = -(-rows // fold) * fold
    width = fold * hidden
    rows_eff = rows_pad // fold

    x_flat = x.reshape(rows, hidden)
    if rows_pad != rows:
        x_flat = jnp.pad(x_flat, ((0, rows_pad - rows), (0, 0)))
    x2d = x_flat.reshape(rows_eff, width)
    w2d = (jnp.tile(weight, fold) if fold > 1 else weight).reshape(1, width)

    x_bytes = jnp.dtype(x.dtype).itemsize
    out_bytes = jnp.dtype(out_dtype).itemsize
    w_bytes = jnp.dtype(weight.dtype).itemsize

    # Generation-aware budgets.
    vmem_cap = _vmem_capacity_bytes()
    tiling_budget = max(8 * 1024 * 1024,
                        min(vmem_cap // 2 - 8 * 1024 * 1024, 56 * 1024 * 1024))
    vmem_limit = min(vmem_cap * 3 // 4, 100 * 1024 * 1024)

    # Fixed (row-tile independent) VMEM residents: weight row (+dbl buf) and,
    # for the folded path, the resident seg matrix.
    fixed_bytes = 2 * width * w_bytes
    if fold > 1:
        fixed_bytes += 2 * width * width * 4

    if row_tile is None:
        row_tile = _pick_row_tile(rows_eff, width, x_bytes, out_bytes,
                                  fixed_bytes, tiling_budget)
    row_tile = min(row_tile, rows_eff)

    grid = (pl.cdiv(rows_eff, row_tile),)

    in_specs = [
        pl.BlockSpec((row_tile, width), lambda i: (i, 0)),
        pl.BlockSpec((1, width), lambda i: (0, 0)),
    ]
    args = [x2d, w2d]
    if fold > 1:
        kernel = functools.partial(_rmsnorm_kernel_folded, eps=eps,
                                   num_features=hidden)
        lane_grp = jnp.arange(width, dtype=jnp.int32) // hidden
        seg = (lane_grp[:, None] == lane_grp[None, :]).astype(jnp.float32)
        in_specs.append(pl.BlockSpec((width, width), lambda i: (0, 0)))
        args.append(seg)
    else:
        kernel = functools.partial(_rmsnorm_kernel_plain, eps=eps)

    out = pl.pallas_call(
        kernel,
        out_shape=jax.ShapeDtypeStruct((rows_eff, width), out_dtype),
        grid_spec=pltpu.PrefetchScalarGridSpec(
            num_scalar_prefetch=0,
            grid=grid,
            in_specs=in_specs,
            out_specs=pl.BlockSpec((row_tile, width), lambda i: (i, 0)),
        ),
        compiler_params=pltpu.CompilerParams(
            dimension_semantics=("parallel",),
            vmem_limit_bytes=vmem_limit),
    )(*args)

    out = out.reshape(rows_pad, hidden)
    if rows_pad != rows:
        out = out[:rows]
    return out.reshape(orig_shape)


# --------------------------------------------------------------------------
# Reference + self-test
# --------------------------------------------------------------------------
def _reference(x, weight, eps):
    x32 = x.astype(jnp.float32)
    n = x32 * jax.lax.rsqrt(jnp.mean(x32 * x32, axis=-1, keepdims=True) + eps)
    return n.astype(x.dtype) * weight


if __name__ == "__main__":
    eps = 1e-6
    key = jax.random.PRNGKey(0)
    kx, kw, kx2, kx3 = jax.random.split(key, 4)

    # Module spec: OpenELMRMSNorm(num_features=32, eps=1e-6), small shapes.
    batch, seq, hidden = 2, 8, 32
    x = jax.random.normal(kx, (batch, seq, hidden), dtype=jnp.float32)
    weight = jnp.ones((hidden,), dtype=jnp.float32) \
        + 0.01 * jax.random.normal(kw, (hidden,), dtype=jnp.float32)

    out = jax.block_until_ready(openelm_rmsnorm(x, weight, eps=eps))
    ref = _reference(x, weight, eps)
    assert out.shape == x.shape and out.dtype == ref.dtype
    assert jnp.allclose(out, ref, atol=1e-5, rtol=1e-5), "mismatch (H=32 path)"

    # Lane-dense H (>=128) path with a multi-step, ragged grid.
    h2 = 256
    x2 = jax.random.normal(kx2, (4, 66, h2), dtype=jnp.float32)
    w2 = jnp.ones((h2,), dtype=jnp.float32)
    out2 = jax.block_until_ready(openelm_rmsnorm(x2, w2, eps=eps, row_tile=64))
    ref2 = _reference(x2, w2, eps)
    assert jnp.allclose(out2, ref2, atol=1e-5, rtol=1e-5), "mismatch (H=256 path)"

    # Folded path with rows NOT divisible by fold (exercises the row padding).
    x3 = jax.random.normal(kx3, (7, 2, hidden), dtype=jnp.float32)   # 14 rows, fold=4
    out3 = jax.block_until_ready(openelm_rmsnorm(x3, weight, eps=eps))
    ref3 = _reference(x3, weight, eps)
    assert jnp.allclose(out3, ref3, atol=1e-5, rtol=1e-5), "mismatch (padded fold)"

    print("KERNEL_OK")
</pallas_src>

<mosaic_0001>
module attributes {stable_mosaic.version = 11 : i64} {
  func.func @_rmsnorm_kernel_folded(%arg0: i32, %arg1: memref<4x128xf32, #tpu.memory_space<vmem>>, %arg2: memref<1x128xf32, #tpu.memory_space<vmem>>, %arg3: memref<128x128xf32, #tpu.memory_space<vmem>>, %arg4: memref<4x128xf32, #tpu.memory_space<vmem>>) attributes {dimension_semantics = [#tpu.dimension_semantics<parallel>], iteration_bounds = array<i64: 1>, scalar_prefetch = 0 : i64, scratch_operands = 0 : i64, tpu.core_type = #tpu.core_type<tc>, window_params = [{transform_indices = @transform_0, window_bounds = array<i64: 4, 128>}, {pipeline_mode = #tpu.pipeline_mode<synchronous>, transform_indices = @transform_1, window_bounds = array<i64: 1, 128>}, {pipeline_mode = #tpu.pipeline_mode<synchronous>, transform_indices = @transform_2, window_bounds = array<i64: 128, 128>}, {transform_indices = @transform_3, window_bounds = array<i64: 4, 128>}]} {
    %c0 = arith.constant 0 : index
    %c0_0 = arith.constant 0 : index
    %0 = vector.load %arg1[%c0, %c0_0] : memref<4x128xf32, #tpu.memory_space<vmem>>, vector<4x128xf32>
    %1 = arith.mulf %0, %0 : vector<4x128xf32>
    %c0_1 = arith.constant 0 : index
    %c0_2 = arith.constant 0 : index
    %2 = vector.load %arg3[%c0_1, %c0_2] : memref<128x128xf32, #tpu.memory_space<vmem>>, vector<128x128xf32>
    %cst = arith.constant dense<0.000000e+00> : vector<4x128xf32>
    %3 = tpu.matmul %1, %2, %cst {dimension_numbers = #tpu.dot_dimension_numbers<[1], [0], [0], [1], [0, 0, 1, 1], [], []>} : vector<4x128xf32>, vector<128x128xf32>, vector<4x128xf32> -> vector<4x128xf32>
    %cst_3 = arith.constant 3.125000e-02 : f32
    %4 = vector.broadcast %cst_3 : f32 to vector<4x128xf32>
    %5 = arith.mulf %3, %4 : vector<4x128xf32>
    %cst_4 = arith.constant 9.99999997E-7 : f32
    %6 = vector.broadcast %cst_4 : f32 to vector<4x128xf32>
    %7 = arith.addf %5, %6 : vector<4x128xf32>
    %8 = math.rsqrt %7 : vector<4x128xf32>
    %9 = arith.mulf %0, %8 : vector<4x128xf32>
    %c0_5 = arith.constant 0 : index
    %c0_6 = arith.constant 0 : index
    %10 = vector.load %arg2[%c0_5, %c0_6] : memref<1x128xf32, #tpu.memory_space<vmem>>, vector<1x128xf32>
    %11 = vector.broadcast %10 : vector<1x128xf32> to vector<4x128xf32>
    %12 = arith.mulf %9, %11 : vector<4x128xf32>
    %c0_7 = arith.constant 0 : index
    %c0_8 = arith.constant 0 : index
    %13 = vector.load %arg4[%c0_7, %c0_8] : memref<4x128xf32, #tpu.memory_space<vmem>>, vector<4x128xf32>
    tpu.vector_store %arg4[%c0_7, %c0_8], %12 {strides = array<i32>} : memref<4x128xf32, #tpu.memory_space<vmem>>, vector<4x128xf32>,
    return
  }
  func.func @transform_0(%arg0: i32) -> (i32, i32) {
    %c0_i32 = arith.constant 0 : i32
    %c0_i32_0 = arith.constant 0 : i32
    return %arg0, %c0_i32 : i32, i32
  }
  func.func @transform_1(%arg0: i32) -> (i32, i32) {
    %c0_i32 = arith.constant 0 : i32
    %c0_i32_0 = arith.constant 0 : i32
    %c0_i32_1 = arith.constant 0 : i32
    return %c0_i32, %c0_i32_0 : i32, i32
  }
  func.func @transform_2(%arg0: i32) -> (i32, i32) {
    %c0_i32 = arith.constant 0 : i32
    %c0_i32_0 = arith.constant 0 : i32
    %c0_i32_1 = arith.constant 0 : i32
    return %c0_i32, %c0_i32_0 : i32, i32
  }
  func.func @transform_3(%arg0: i32) -> (i32, i32) {
    %c0_i32 = arith.constant 0 : i32
    %c0_i32_0 = arith.constant 0 : i32
    return %arg0, %c0_i32 : i32, i32
  }
}

</mosaic_0001>

<bundles_post_ra>
// kernel: tpu_custom_call.1
= control target key start
LH: loop header
LB: loop body
LE: loop exit
PB: predicated region body
PF: predicated region fallthrough
CT: control target
= control target key end

     0   :  { %8 = vsyncpa [#allocation3], 0  ;;  %s391_s0 = inlined_call_operand.hbm [shape: f32[4,128], index: 0, kind: input, shape index: {}]   ;;  %s392_s1 = inlined_call_operand.vmem [shape: f32[1,128], index: 1, kind: input, shape index: {}]   ;;  %s393_s2 = inlined_call_operand.hbm [shape: f32[128,128], index: 2, kind: input, shape index: {}]   ;;  %s394_s3 = inlined_call_operand.hbm [shape: f32[4,128], index: 3, kind: output, shape index: {}]  }
   0x1   :  { %9 = vsyncpa [#allocation6], 0 }
   0x2   :  { %10 = vsyncpa [#allocation4], 0  ;;  %s317_s12 = smov [#allocation2]   ;;  %s318_s14 = smov [#allocation5]  }
   0x3   :  { %s17_s13 = sshll.u32 %s317_s12, 4  ;;  %s28_s15 = sshll.u32 %s318_s14, 4  ;;  %s18_s13 = int_to_ptr.vmem [resolvable:$true] %s17_s13  ;;  %s345_s15 = int_to_ptr.vmem [resolvable:$true] %s28_s15 }
   0x4   :  { %s245_s18 = scalar_lea.hbm %s391_s0, 64 }
   0x5   :  { %p246_p0 = scmp.ne.s32.totalorder %s391_s0, %s245_s18  ;;  %p249_p1 = scmp.lt.u32.totalorder %s245_s18, %s391_s0 }
   0x7   :  { %p251_p2 = pnand %p249_p1, %p246_p0 }
   0x9   :  { %254 = shalt.err (!%p251_p2)
}
   0xa   :  { %s255_s23 = scalar_lea.vmem %s18_s13, 64  ;;  %p260_p4 = scmp.lt.s32.totalorder %s18_s13, %s18_s13 }
   0xb   :  { %p256_p3 = scmp.ne.s32.totalorder %s18_s13, %s255_s23  ;;  %p261_p5 = scmp.lt.s32.totalorder %s255_s23, %s255_s23 }
   0xd   :  { %p262_p6 = por %p261_p5, %p260_p4 }
   0xf   :  { %p263_p7 = pnand %p262_p6, %p256_p3 }
  0x11   :  { %266 = shalt.err (!%p263_p7)
}
  0x12   :  { %20 = dma.hbm_to_vmem [thread:$0]  %s391_s0, 64, %s18_s13, [#allocation3]  }
  0x13   :  { %s267_s28 = scalar_lea.hbm %s393_s2, 2048 }
  0x14   :  { %p268_p8 = scmp.ne.s32.totalorder %s393_s2, %s267_s28  ;;  %p271_p9 = scmp.lt.u32.totalorder %s267_s28, %s393_s2 }
  0x16   :  { %p273_p10 = pnand %p271_p9, %p268_p8 }
  0x18   :  { %276 = shalt.err (!%p273_p10)
}
  0x19   :  { %s277_s6 = scalar_lea.vmem %s345_s15, 2048  ;;  %p282_p12 = scmp.lt.s32.totalorder %s345_s15, %s345_s15 }
  0x1a   :  { %p278_p11 = scmp.ne.s32.totalorder %s345_s15, %s277_s6  ;;  %p283_p13 = scmp.lt.s32.totalorder %s277_s6, %s277_s6 }
  0x1c   :  { %p284_p0 = por %p283_p13, %p282_p12 }
  0x1e   :  { %p285_p1 = pnand %p284_p0, %p278_p11 }
  0x20   :  { %288 = shalt.err (!%p285_p1)
}
  0x21   :  { %s319_s0 = smov 128   ;;  %s320_s7 = smov 8  }
  0x22   :  { %34 = dma.hbm_to_vmem [thread:$0]  %s393_s2, 2048, %s345_s15, [#allocation6], %s319_s0, %s319_s0, %s320_s7  }
  0x23   :  { %311 = dma.done.wait [#allocation3], 64  }
  0x24   :  { %312 = vsyncadd [#allocation3], 4294967232 }
  0x25   :  { %313 = dma.done.wait [#allocation6], 2048  }
  0x26   :  { %314 = vsyncadd [#allocation6], 4294965248  ;;  %v321_v0 = vmov 0.0|0.0   ;;  %vm322_vm0 = vmmov 0   ;;  %v323_v1 = vmov 0.0   ;;  %v43_v2 = vld [vmem:[#allocation5] sm:$0xff] }
  0x27   :  { %211 = vmatprep.subr.bf16.mxu0 %v321_v0  ;;  %208 = vmatprep.mubr.msk.f32.mxu0 %vm322_vm0, %v323_v1  ;;  %v44_v3 = vld [vmem:[#allocation5 + $0x8] sm:$0xff]  ;;  %v45_v4 = vld [vmem:[#allocation5 + $0x10] sm:$0xff]  ;;  %v46_v6 = vld [vmem:[#allocation5 + $0x18] sm:$0xff]  ;;  %s324_s11 = smov [#allocation7]  }
  0x28   :  { %v212_v5 = vpack.c.bf16 %v44_v3, %v43_v2  ;;  %v215_v7 = vpack.c.bf16 %v46_v6, %v45_v4  ;;  %v47_v8 = vld [vmem:[#allocation5 + $0x20] sm:$0xff]  ;;  %v48_v9 = vld [vmem:[#allocation5 + $0x28] sm:$0xff]  ;;  %v49_v11 = vld [vmem:[#allocation5 + $0x30] sm:$0xff]  ;;  %s148_s12 = sshll.u32 %s324_s11, 4  ;;  %s149_s12 = int_to_ptr.vmem [resolvable:$true] %s148_s12 }
  0x29   :  { %v218_v10 = vpack.c.bf16 %v48_v9, %v47_v8  ;;  %v50_v12 = vld [vmem:[#allocation5 + $0x38] sm:$0xff]  ;;  %v51_v14 = vld [vmem:[#allocation5 + $0x40] sm:$0xff]  ;;  %v52_v15 = vld [vmem:[#allocation5 + $0x48] sm:$0xff]  ;;  %s289_s13 = scalar_lea.vmem %s149_s12, 64  ;;  %p294_p3 = scmp.lt.s32.totalorder %s149_s12, %s149_s12 }
  0x2a   :  { %213 = vmatpush3.bf16.msra.mxu0 %v212_v5  ;;  %v221_v13 = vpack.c.bf16 %v50_v12, %v49_v11  ;;  %v224_v16 = vpack.c.bf16 %v52_v15, %v51_v14  ;;  %v53_v17 = vld [vmem:[#allocation5 + $0x50] sm:$0xff]  ;;  %v54_v18 = vld [vmem:[#allocation5 + $0x58] sm:$0xff]  ;;  %v55_v20 = vld [vmem:[#allocation5 + $0x60] sm:$0xff]  ;;  %p290_p2 = scmp.ne.s32.totalorder %s149_s12, %s289_s13  ;;  %p295_p4 = scmp.lt.s32.totalorder %s289_s13, %s289_s13 }
  0x2b   :  { %214 = vmatprep.subr.bf16.mxu0 %v321_v0  ;;  %v227_v19 = vpack.c.bf16 %v54_v18, %v53_v17  ;;  %v56_v21 = vld [vmem:[#allocation5 + $0x68] sm:$0xff]  ;;  %v57_v23 = vld [vmem:[#allocation5 + $0x70] sm:$0xff]  ;;  %v58_v24 = vld [vmem:[#allocation5 + $0x78] sm:$0xff] }
  0x2c   :  { %v230_v22 = vpack.c.bf16 %v56_v21, %v55_v20  ;;  %v233_v25 = vpack.c.bf16 %v58_v24, %v57_v23  ;;  %v41_v26 = vld [vmem:[#allocation2] sm:$0xf]  ;;  %p296_p5 = por %p295_p4, %p294_p3 }
  0x2d   :  { %v42_v27 = vmul.f32 %v41_v26, %v41_v26  ;;  %v158_v33 = vld [vmem:[%s392_s1] ss:$0 sm:$0xff] }
  0x2e   :  { %216 = vmatpush3.bf16.msra.mxu0 %v215_v7  ;;  %p297_p6 = pnand %p296_p5, %p290_p2 }
  0x2f   :  { %217 = vmatprep.subr.bf16.mxu0 %v321_v0 }
  0x32   :  { %219 = vmatpush3.bf16.msra.mxu0 %v218_v10 }
  0x33   :  { %220 = vmatprep.subr.bf16.mxu0 %v321_v0 }
  0x36   :  { %222 = vmatpush3.bf16.msra.mxu0 %v221_v13 }
  0x37   :  { %223 = vmatprep.subr.bf16.mxu0 %v321_v0 }
  0x3a   :  { %225 = vmatpush3.bf16.msra.mxu0 %v224_v16 }
  0x3b   :  { %226 = vmatprep.subr.bf16.mxu0 %v321_v0 }
  0x3e   :  { %228 = vmatpush3.bf16.msra.mxu0 %v227_v19 }
  0x3f   :  { %229 = vmatprep.subr.bf16.mxu0 %v321_v0 }
  0x42   :  { %231 = vmatpush3.bf16.msra.mxu0 %v230_v22 }
  0x43   :  { %232 = vmatprep.subr.bf16.mxu0 %v321_v0 }
  0x46   :  { %234 = vmatpush3.bf16.msra.mxu0 %v233_v25 }
  0x49   :  { %209 = vmatmul.mubr.f32.vlgmr.msra.gmra.mrb[0].mxu0 %v42_v27 }
 0x11c   :  { %v125_v28 = vpop.f32.mrb[0].mxu0 }
 0x11d   :  { %v129_v29 = vmul.f32 0.03125, %v125_v28  ;;  %v210_v30 = vpop.f32.mrb[1].mxu0 }
 0x11f   :  { %v130_v31 = vadd.f32 1e-06, %v129_v29 }
 0x121   :  { %243 = vrsqrt.f32 %v130_v31 }
 0x12b   :  { %v244_v32 = vpop.eup %243 }
 0x12c   :  { %v132_v34 = vmul.f32 %v244_v32, %v41_v26 }
 0x12e   :  { %v140_v35 = vmul.f32 %v158_v33, %v132_v34 }
 0x130   :  { %141 = vst [vmem:[#allocation7] sm:$0xf] %v140_v35 }
 0x131   :  { %300 = shalt.err (!%p297_p6)
}
 0x132   :  { %s301_s16 = scalar_lea.hbm %s394_s3, 64 }
 0x133   :  { %p302_p7 = scmp.ne.s32.totalorder %s394_s3, %s301_s16  ;;  %p305_p8 = scmp.lt.u32.totalorder %s301_s16, %s394_s3 }
 0x135   :  { %p307_p9 = pnand %p305_p8, %p302_p7 }
 0x137   :  { %310 = shalt.err (!%p307_p9)
}
 0x138   :  { %151 = dma.vmem_to_hbm [thread:$0]  %s149_s12, 64, %s394_s3, [#allocation4]  }
 0x139   :  { %315 = dma.done.wait [#allocation4], 64  }
 0x13a   :  { %316 = vsyncadd [#allocation4], 4294967232 }
 0x13b   :  { %155 = vsyncpa [#allocation3], 1 }
 0x13c   :  { %156 = vsyncpa [#allocation6], 1 }
 0x13d   :  { %157 = vsyncpa [#allocation4], 1 }

</bundles_post_ra>
